<compile_context>
chip_gen: v5e
topology: v5e:2x2
jax: 0.10.0
libtpu: 0.0.40
codegen_flags: <defaults>
</compile_context>

<pallas_src>
import functools

import jax
import jax.numpy as jnp
from jax.experimental import pallas as pl
from jax.experimental.pallas import tpu as pltpu


def _round_up(v, m):
    return ((v + m - 1) // m) * m


def _choose_tile(dim, cap, *, min_tiles=1):
    """Pick a tile size (multiple of 128, <= cap) minimizing padded elements.

    Ties broken toward the larger tile (fewer grid steps). If min_tiles > 1 we require
    at least that many tiles (v7x megacore) when any candidate allows it.
    """
    dim128 = _round_up(dim, 128)
    cap = max(128, min(cap, dim128))
    candidates = list(range(128, cap + 1, 128))
    filtered = [t for t in candidates if _round_up(dim, t) // t >= min_tiles]
    if not filtered:
        filtered = candidates
    return min(filtered, key=lambda t: (_round_up(dim, t) - dim, -t))


def _bbb_linear_kernel(x_ref, w_ref, bve_ref, out_ref, acc_var_ref, *, mc_scale):
    k = pl.program_id(2)

    @pl.when(k == 0)
    def _():
        # out_ref's block index (i, j) is k-invariant -> VMEM-resident across K, so it
        # doubles as the f32 mean accumulator (no extra scratch, no epilogue copy).
        out_ref[...] = jnp.zeros_like(out_ref)
        acc_var_ref[...] = jnp.zeros_like(acc_var_ref)

    # One x DMA serves both MXU accumulations for this K tile.
    x = x_ref[...]                                   # (tm, tk), f32
    x2 = jnp.maximum(x * x, 1e-4)                    # VPU in f32 (v5e-safe)
    mat_dtype = w_ref.dtype                          # bf16 (default) or f32 weight stream
    out_ref[...] += jnp.dot(x.astype(mat_dtype), w_ref[0],
                            preferred_element_type=jnp.float32)
    acc_var_ref[...] += jnp.dot(x2.astype(mat_dtype), w_ref[1],
                                preferred_element_type=jnp.float32)

    # Fused epilogue: bias add, sqrt, frozen-eps reparameterization, mc_sample scaling,
    # one unmasked lane-dense store per output tile.
    @pl.when(k == pl.num_programs(2) - 1)
    def _():
        b_mean = bve_ref[0:1, :]                     # (1, tn)
        b_var = bve_ref[1:2, :]
        eps = bve_ref[2:3, :]
        act_mean = out_ref[...] + b_mean
        act_std = jnp.sqrt(acc_var_ref[...] + b_var)
        out_ref[...] = ((act_mean + act_std * eps) * mc_scale).astype(out_ref.dtype)


def prepare_bbb_params(w_mean, w_rho, b_mean, b_rho, eps, *,
                       tn_cap=512, tk_cap=1024, weight_dtype=jnp.bfloat16):
    """One-time parameter preparation (softplus/clamp/transpose/pad/stack).

    Do this once per weight update, NOT per forward call, to avoid an extra HBM pass
    over both weight matrices on every call.
    """
    out_f, in_f = w_mean.shape
    # Minimize padded (streamed-from-HBM) weight bytes; guarantee >= 2 N tiles when the
    # layer is big enough so both v7x TensorCores get work even at tiny batch.
    tn = _choose_tile(out_f, tn_cap, min_tiles=2 if out_f >= 256 else 1)
    tk = _choose_tile(in_f, tk_cap)
    np_ = _round_up(out_f, tn)
    kp = _round_up(in_f, tk)

    w_var = jnp.maximum(jax.nn.softplus(w_rho) ** 2, 1e-4)
    b_var = jnp.maximum(jax.nn.softplus(b_rho) ** 2, 1e-4)

    # Stacked (In, Out)-oriented weight operand: [W_mean^T, clamp(W_std^2)^T].
    # CORRECTNESS: K-padding rows MUST be exactly zero.  Inside the kernel, padded x
    # columns become max(0^2, 1e-4) = 1e-4 after the clamp; only the exact-zero padded
    # weight rows cancel them in the variance matmul.  Do not quantize/perturb padding.
    w_stack = jnp.stack([w_mean.T, w_var.T]).astype(weight_dtype)      # (2, In, Out)
    w_stack = jnp.pad(w_stack, ((0, 0), (0, kp - in_f), (0, np_ - out_f)))

    # Rows: [bias_mean, clamp(bias_std^2), frozen epsilon] -- lane-dense (3, Np), f32.
    bve = jnp.stack([b_mean, b_var, eps]).astype(jnp.float32)          # (3, Out)
    bve = jnp.pad(bve, ((0, 0), (0, np_ - out_f)))

    return dict(w_stack=w_stack, bve=bve,
                in_features=in_f, out_features=out_f, tn=tn, tk=tk)


def bbb_linear_forward(x, params, *, mc_sample=1, tm=256, weight_buffers=None):
    """x: (B, in_features) f32. params: output of prepare_bbb_params.

    Note: dividing a single frozen-eps sample by mc_sample matches the PyTorch module's
    'activations' branch; it is only an MC average when mc_sample == 1.
    """
    b, in_f = x.shape
    assert in_f == params["in_features"]
    out_f = params["out_features"]
    tn, tk = params["tn"], params["tk"]
    w_stack, bve = params["w_stack"], params["bve"]
    _, kp, np_ = w_stack.shape

    # Minimize the number of M tiles (the weight stream is re-fetched once per M tile),
    # then shrink tm to the actual need (multiple of 8) so padding rows stay small.
    m_tiles = max(1, pl.cdiv(b, tm))
    tm_eff = _round_up(pl.cdiv(b, m_tiles), 8)
    mp = m_tiles * tm_eff

    x = x.astype(jnp.float32)
    if mp != b or kp != in_f:
        x_p = jnp.pad(x, ((0, mp - b), (0, kp - in_f)))
    else:
        x_p = x                              # already tile-aligned: no wrapper HBM pass

    grid = (m_tiles, np_ // tn, kp // tk)
    kernel = functools.partial(_bbb_linear_kernel, mc_scale=1.0 / mc_sample)

    w_spec_kwargs = {}
    if weight_buffers is not None and weight_buffers != 2:
        # Only if a profile shows exposed weight DMA at step boundaries.
        w_spec_kwargs["pipeline_mode"] = pl.Buffered(weight_buffers)

    w_bytes = int(w_stack.size) * w_stack.dtype.itemsize
    cost = pl.CostEstimate(
        flops=2 * 2 * mp * kp * np_,                        # two matmuls
        transcendentals=mp * np_,                           # sqrt in the epilogue
        bytes_accessed=int(x_p.size) * 4 + w_bytes * m_tiles
                       + mp * np_ * 4 + int(bve.size) * 4,
    )

    out_p = pl.pallas_call(
        kernel,
        out_shape=jax.ShapeDtypeStruct((mp, np_), jnp.float32),
        grid_spec=pltpu.PrefetchScalarGridSpec(
            num_scalar_prefetch=0,
            grid=grid,
            in_specs=[
                pl.BlockSpec((tm_eff, tk), lambda i, j, k: (i, k)),    # x
                pl.BlockSpec((2, tk, tn), lambda i, j, k: (0, k, j),   # stacked weights
                             **w_spec_kwargs),
                pl.BlockSpec((3, tn), lambda i, j, k: (0, j)),         # bias/var/eps
            ],
            out_specs=pl.BlockSpec((tm_eff, tn), lambda i, j, k: (i, j)),
            scratch_shapes=[pltpu.VMEM((tm_eff, tn), jnp.float32)],    # var accumulator
        ),
        compiler_params=pltpu.CompilerParams(
            dimension_semantics=("parallel", "parallel", "arbitrary"),
            vmem_limit_bytes=48 * 1024 * 1024,
        ),
        cost_estimate=cost,
    )(x_p, w_stack, bve)

    return out_p[:b, :out_f]


def bbb_linear_reference(x, w_mean, w_rho, b_mean, b_rho, eps, mc_sample=1):
    w_std = jax.nn.softplus(w_rho)
    b_std = jax.nn.softplus(b_rho)
    act_mean = x @ w_mean.T + b_mean
    act_var = (jnp.maximum(x * x, 1e-4) @ jnp.maximum(w_std ** 2, 1e-4).T
               + jnp.maximum(b_std ** 2, 1e-4))
    return (act_mean + jnp.sqrt(act_var) * eps[None, :]) / mc_sample


if __name__ == "__main__":
    # Small, deliberately non-aligned shapes: exercises M/N/K padding, tile selection
    # (tn picked to minimize padding and keep >=2 N tiles), and the fused epilogue.
    B, in_features, out_features = 12, 200, 300
    rho_init = -3.0

    key = jax.random.PRNGKey(0)
    kx, kw, kb, ke = jax.random.split(key, 4)

    x = jax.random.normal(kx, (B, in_features), dtype=jnp.float32)
    w_mean = 0.1 * jax.random.normal(kw, (out_features, in_features), dtype=jnp.float32)
    w_rho = jnp.full((out_features, in_features), rho_init, dtype=jnp.float32)
    b_mean = 0.1 * jax.random.normal(kb, (out_features,), dtype=jnp.float32)
    b_rho = jnp.full((out_features,), rho_init, dtype=jnp.float32)
    # eval + freeze_on_eval: epsilon sampled once per output feature, shared over batch.
    eps = jax.random.normal(ke, (out_features,), dtype=jnp.float32)

    ref = bbb_linear_reference(x, w_mean, w_rho, b_mean, b_rho, eps)

    # Default path: bf16 weight streaming (mem-bound lever on all generations), f32 accum.
    params_bf16 = prepare_bbb_params(w_mean, w_rho, b_mean, b_rho, eps)
    out_bf16 = jax.block_until_ready(bbb_linear_forward(x, params_bf16, mc_sample=1))
    assert out_bf16.shape == (B, out_features)
    assert jnp.allclose(out_bf16, ref, atol=5e-2, rtol=5e-2), "bf16 mismatch vs reference"

    # f32 weight stream + small tile caps to force a multi-tile (1, 3, 2) grid with real
    # K accumulation; tight tolerance.
    params_f32 = prepare_bbb_params(w_mean, w_rho, b_mean, b_rho, eps,
                                    tn_cap=128, tk_cap=128, weight_dtype=jnp.float32)
    out_f32 = jax.block_until_ready(bbb_linear_forward(x, params_f32, mc_sample=1, tm=8))
    assert out_f32.shape == (B, out_features)
    assert jnp.allclose(out_f32, ref, atol=1e-4, rtol=1e-4), "f32 mismatch vs reference"

    print("KERNEL_OK")
</pallas_src>

<mosaic_0001>
module attributes {stable_mosaic.version = 11 : i64} {
  func.func @_bbb_linear_kernel(%arg0: i32, %arg1: i32, %arg2: i32, %arg3: memref<16x256xf32, #tpu.memory_space<vmem>>, %arg4: memref<2x256x128xbf16, #tpu.memory_space<vmem>>, %arg5: memref<3x128xf32, #tpu.memory_space<vmem>>, %arg6: memref<16x128xf32, #tpu.memory_space<vmem>>, %arg7: memref<16x128xf32, #tpu.memory_space<vmem>>) attributes {dimension_semantics = [#tpu.dimension_semantics<parallel>, #tpu.dimension_semantics<parallel>, #tpu.dimension_semantics<arbitrary>], iteration_bounds = array<i64: 1, 3, 1>, scalar_prefetch = 0 : i64, scratch_operands = 1 : i64, tpu.core_type = #tpu.core_type<tc>, window_params = [{transform_indices = @transform_0, window_bounds = array<i64: 16, 256>}, {transform_indices = @transform_1, window_bounds = array<i64: 2, 256, 128>}, {transform_indices = @transform_2, window_bounds = array<i64: 3, 128>}, {transform_indices = @transform_3, window_bounds = array<i64: 16, 128>}]} {
    %c0_i32 = arith.constant 0 : i32
    %0 = arith.cmpi eq, %arg2, %c0_i32 : i32
    %1 = arith.extui %0 : i1 to i32
    %c0_i32_0 = arith.constant 0 : i32
    %2 = arith.cmpi ne, %1, %c0_i32_0 : i32
    scf.if %2 {
      %cst_19 = arith.constant 0.000000e+00 : f32
      %24 = vector.broadcast %cst_19 : f32 to vector<16x128xf32>
      %c0_20 = arith.constant 0 : index
      %c0_21 = arith.constant 0 : index
      %25 = vector.load %arg6[%c0_20, %c0_21] : memref<16x128xf32, #tpu.memory_space<vmem>>, vector<16x128xf32>
      tpu.vector_store %arg6[%c0_20, %c0_21], %24 {strides = array<i32>} : memref<16x128xf32, #tpu.memory_space<vmem>>, vector<16x128xf32>,
      %cst_22 = arith.constant 0.000000e+00 : f32
      %26 = vector.broadcast %cst_22 : f32 to vector<16x128xf32>
      %c0_23 = arith.constant 0 : index
      %c0_24 = arith.constant 0 : index
      %27 = vector.load %arg7[%c0_23, %c0_24] : memref<16x128xf32, #tpu.memory_space<vmem>>, vector<16x128xf32>
      tpu.vector_store %arg7[%c0_23, %c0_24], %26 {strides = array<i32>} : memref<16x128xf32, #tpu.memory_space<vmem>>, vector<16x128xf32>,
    } else {
    }
    %c0 = arith.constant 0 : index
    %c0_1 = arith.constant 0 : index
    %3 = vector.load %arg3[%c0, %c0_1] : memref<16x256xf32, #tpu.memory_space<vmem>>, vector<16x256xf32>
    %4 = arith.mulf %3, %3 : vector<16x256xf32>
    %cst = arith.constant 9.99999974E-5 : f32
    %5 = vector.broadcast %cst : f32 to vector<16x256xf32>
    %6 = arith.maximumf %4, %5 : vector<16x256xf32>
    %c0_2 = arith.constant 0 : index
    %c0_3 = arith.constant 0 : index
    %7 = vector.load %arg6[%c0_2, %c0_3] : memref<16x128xf32, #tpu.memory_space<vmem>>, vector<16x128xf32>
    %8 = arith.truncf %3 : vector<16x256xf32> to vector<16x256xbf16>
    %c0_4 = arith.constant 0 : index
    %c0_5 = arith.constant 0 : index
    %c0_6 = arith.constant 0 : index
    %9 = vector.load %arg4[%c0_4, %c0_5, %c0_6] : memref<2x256x128xbf16, #tpu.memory_space<vmem>>, vector<1x256x128xbf16>
    %10 = vector.shape_cast %9 : vector<1x256x128xbf16> to vector<256x128xbf16>
    %cst_7 = arith.constant dense<0.000000e+00> : vector<16x128xf32>
    %11 = tpu.matmul %8, %10, %cst_7 {dimension_numbers = #tpu.dot_dimension_numbers<[1], [0], [0], [1], [0, 0, 1, 1], [], []>} : vector<16x256xbf16>, vector<256x128xbf16>, vector<16x128xf32> -> vector<16x128xf32>
    %12 = arith.addf %7, %11 : vector<16x128xf32>
    %c0_8 = arith.constant 0 : index
    %c0_9 = arith.constant 0 : index
    %13 = vector.load %arg6[%c0_8, %c0_9] : memref<16x128xf32, #tpu.memory_space<vmem>>, vector<16x128xf32>
    tpu.vector_store %arg6[%c0_8, %c0_9], %12 {strides = array<i32>} : memref<16x128xf32, #tpu.memory_space<vmem>>, vector<16x128xf32>,
    %c0_10 = arith.constant 0 : index
    %c0_11 = arith.constant 0 : index
    %14 = vector.load %arg7[%c0_10, %c0_11] : memref<16x128xf32, #tpu.memory_space<vmem>>, vector<16x128xf32>
    %15 = arith.truncf %6 : vector<16x256xf32> to vector<16x256xbf16>
    %c1 = arith.constant 1 : index
    %c0_12 = arith.constant 0 : index
    %c0_13 = arith.constant 0 : index
    %16 = vector.load %arg4[%c1, %c0_12, %c0_13] : memref<2x256x128xbf16, #tpu.memory_space<vmem>>, vector<1x256x128xbf16>
    %17 = vector.shape_cast %16 : vector<1x256x128xbf16> to vector<256x128xbf16>
    %cst_14 = arith.constant dense<0.000000e+00> : vector<16x128xf32>
    %18 = tpu.matmul %15, %17, %cst_14 {dimension_numbers = #tpu.dot_dimension_numbers<[1], [0], [0], [1], [0, 0, 1, 1], [], []>} : vector<16x256xbf16>, vector<256x128xbf16>, vector<16x128xf32> -> vector<16x128xf32>
    %19 = arith.addf %14, %18 : vector<16x128xf32>
    %c0_15 = arith.constant 0 : index
    %c0_16 = arith.constant 0 : index
    %20 = vector.load %arg7[%c0_15, %c0_16] : memref<16x128xf32, #tpu.memory_space<vmem>>, vector<16x128xf32>
    tpu.vector_store %arg7[%c0_15, %c0_16], %19 {strides = array<i32>} : memref<16x128xf32, #tpu.memory_space<vmem>>, vector<16x128xf32>,
    %c0_i32_17 = arith.constant 0 : i32
    %21 = arith.cmpi eq, %arg2, %c0_i32_17 : i32
    %22 = arith.extui %21 : i1 to i32
    %c0_i32_18 = arith.constant 0 : i32
    %23 = arith.cmpi ne, %22, %c0_i32_18 : i32
    scf.if %23 {
      %c0_19 = arith.constant 0 : index
      %c0_20 = arith.constant 0 : index
      %24 = vector.load %arg5[%c0_19, %c0_20] : memref<3x128xf32, #tpu.memory_space<vmem>>, vector<1x128xf32>
      %c1_21 = arith.constant 1 : index
      %c0_22 = arith.constant 0 : index
      %25 = vector.load %arg5[%c1_21, %c0_22] : memref<3x128xf32, #tpu.memory_space<vmem>>, vector<1x128xf32>
      %c2 = arith.constant 2 : index
      %c0_23 = arith.constant 0 : index
      %26 = vector.load %arg5[%c2, %c0_23] : memref<3x128xf32, #tpu.memory_space<vmem>>, vector<1x128xf32>
      %c0_24 = arith.constant 0 : index
      %c0_25 = arith.constant 0 : index
      %27 = vector.load %arg6[%c0_24, %c0_25] : memref<16x128xf32, #tpu.memory_space<vmem>>, vector<16x128xf32>
      %28 = vector.broadcast %24 : vector<1x128xf32> to vector<16x128xf32>
      %29 = arith.addf %27, %28 : vector<16x128xf32>
      %c0_26 = arith.constant 0 : index
      %c0_27 = arith.constant 0 : index
      %30 = vector.load %arg7[%c0_26, %c0_27] : memref<16x128xf32, #tpu.memory_space<vmem>>, vector<16x128xf32>
      %31 = vector.broadcast %25 : vector<1x128xf32> to vector<16x128xf32>
      %32 = arith.addf %30, %31 : vector<16x128xf32>
      %33 = math.sqrt %32 : vector<16x128xf32>
      %34 = vector.broadcast %26 : vector<1x128xf32> to vector<16x128xf32>
      %35 = arith.mulf %33, %34 : vector<16x128xf32>
      %36 = arith.addf %29, %35 : vector<16x128xf32>
      %cst_28 = arith.constant 1.000000e+00 : f32
      %37 = vector.broadcast %cst_28 : f32 to vector<16x128xf32>
      %38 = arith.mulf %36, %37 : vector<16x128xf32>
      %c0_29 = arith.constant 0 : index
      %c0_30 = arith.constant 0 : index
      %39 = vector.load %arg6[%c0_29, %c0_30] : memref<16x128xf32, #tpu.memory_space<vmem>>, vector<16x128xf32>
      tpu.vector_store %arg6[%c0_29, %c0_30], %38 {strides = array<i32>} : memref<16x128xf32, #tpu.memory_space<vmem>>, vector<16x128xf32>,
    } else {
    }
    return
  }
  func.func @transform_0(%arg0: i32, %arg1: i32, %arg2: i32) -> (i32, i32) {
    %c0_i32 = arith.constant 0 : i32
    return %arg0, %arg2 : i32, i32
  }
  func.func @transform_1(%arg0: i32, %arg1: i32, %arg2: i32) -> (i32, i32, i32) {
    %c0_i32 = arith.constant 0 : i32
    %c0_i32_0 = arith.constant 0 : i32
    return %c0_i32, %arg2, %arg1 : i32, i32, i32
  }
  func.func @transform_2(%arg0: i32, %arg1: i32, %arg2: i32) -> (i32, i32) {
    %c0_i32 = arith.constant 0 : i32
    %c0_i32_0 = arith.constant 0 : i32
    return %c0_i32, %arg1 : i32, i32
  }
  func.func @transform_3(%arg0: i32, %arg1: i32, %arg2: i32) -> (i32, i32) {
    %c0_i32 = arith.constant 0 : i32
    return %arg0, %arg1 : i32, i32
  }
}

</mosaic_0001>

<bundles_post_ra>
// kernel: tpu_custom_call.1
= control target key start
LH: loop header
LB: loop body
LE: loop exit
PB: predicated region body
PF: predicated region fallthrough
CT: control target
= control target key end

     0   :  { %s1545_s0 = inlined_call_operand.hbm [shape: f32[16,256], index: 0, kind: input, shape index: {}]   ;;  %s1546_s1 = inlined_call_operand.hbm [shape: bf16[2,256,384], index: 1, kind: input, shape index: {}]   ;;  %s1547_s2 = inlined_call_operand.hbm [shape: f32[3,384], index: 2, kind: input, shape index: {}]   ;;  %s1548_s3 = inlined_call_operand.hbm [shape: f32[16,384], index: 3, kind: output, shape index: {}]  }
   0x1   :  { %1549 = sst [smem:[#allocation13_spill]] %s1545_s0 }
   0x2   :  { %1550 = sst [smem:[#allocation14_spill]] %s1546_s1 }
   0x3   :  { %8 = vsyncpa [#allocation4], 0 }
   0x4   :  { %9 = vsyncpa [#allocation7], 0 }
   0x5   :  { %11 = vsyncpa [#allocation7 + $0x1], 0 }
   0x6   :  { %12 = vsyncpa [#allocation5], 0 }
   0x7   :  { %14 = vsyncpa [#allocation5 + $0x1], 0  ;;  %s1336_s12 = smov 0   ;;  %s1338_s13 = smov 0  }
   0x8   :  { %s1340_s14 = smov 0   ;;  %s1342_s15 = smov 0  }
   0x9   :  { %s1344_s16 = smov 0   ;;  %s1346_s17 = smov 0  }
   0xa LB: > { %s35_s18 = sadd.s32 1, %s1301_s16  ;;  %s76_s19 = sadd.s32 1, %s1293_s14  ;;  %s1305_s17 = sphi %s1346_s17, %s20_s17   ;;  %s1301_s16 = sphi %s1344_s16, %s1563_s16   ;;  %s1297_s15 = sphi %s1342_s15, %s1562_s15   ;;  %s1293_s14 = sphi %s1340_s14, %s1561_s14   ;;  %s1289_s13 = sphi %s1338_s13, %s1560_s13   ;;  %s1285_s12 = sphi %s1336_s12, %s1559_s12  }
   0xb   : > { %p37_p0 = scmp.ge.s32.totalorder %s35_s18, 3  ;;  %p83_p1 = scmp.ne.s32.totalorder %s1293_s14, %s1289_s13 }
   0xc   : > { %p84_p2 = scmp.eq.s32.totalorder %s1305_s17, 0  ;;  %p1061_p4 = scmp.lt.s32.totalorder %s1305_s17, 3 }
   0xd   : > { %s1565_s18 = smov (%p37_p0, %s35_s18), 0  ;;  %s187_s22 = sand.u32 1, %s1305_s17  }
   0xe   : > { %p1376_p3 = por %p84_p2, %p83_p1  ;;  %s72_s21 = ssub.s32 %s1301_s16, %s1565_s18 }
   0xf   : > { %p74_p5 = scmp.eq.s32.totalorder %s72_s21, 0  ;;  %s189_s23 = sand.u32 1, %s1293_s14  }
  0x10   : > { %s831_s24 = sshll.u32 %s1301_s16, 2  ;;  %s830_s26 = sshll.u32 %s189_s23, 8 }
  0x11   : > { %s1387_s25 = scalar_select %p74_p5, %s1293_s14, %s76_s19  }
  0x12   : > { %s1552_s1 = sld [smem:[#allocation14_spill]]  ;;  %s191_s4 = scalar_lea.vmem [#allocation6], %s830_s26 }
  0x13   : > { %s201_s5 = sshll.u32 %s191_s4, 4  ;;  %p1400_p6 = pnand %p1061_p4, %p1376_p3  ;;  %s202_s5 = int_to_ptr.vmem [resolvable:$true] %s201_s5 }
  0x14   : > { %s1404_s7 = scalar_lea.sflag [#allocation7], %s187_s22  ;;  %s1307_s8 = smov 192  }
  0x15   : > { %s1308_s9 = smov 64   ;;  %s1309_s10 = smov 4  }
  0x16   : > { %s1410_s11 = sadd.s32 4294967295, %s1305_s17   ;;  %s826_s19 = sadd.s32 4294967294, %s1305_s17  }
  0x17   : > { %p89_p7 = scmp.ne.s32.totalorder %s1289_s13, %s1285_s12  ;;  %p90_p8 = scmp.eq.s32.totalorder %s1410_s11, 0 }
  0x18   : > { %s198_s29 = scalar_lea.hbm %s1552_s1, %s831_s24  ;;  %p141_p9 = scmp.eq.s32.totalorder %s1410_s11, 2 }
  0x19   : > { %s199_s30 = sshll.u32 %s198_s29, 4  ;;  %p147_p10 = scmp.eq.s32.totalorder %s826_s19, 2  ;;  %s200_s30 = int_to_ptr.hbm [resolvable:$true] %s199_s30 }
  0x1a   : > { %1052 = dma.hbm_to_vmem [thread:$0]  (!%p1400_p6), %s200_s30, 4096, %s202_s5, %s1404_s7, %s1307_s8, %s1308_s9, %s1309_s10  }
  0x1b   : > { %p1419_p11 = por %p90_p8, %p89_p7  ;;  %p827_p12 = scmp.ge.s32.totalorder %s1305_s17, 1 }
  0x1c   : > { %p1427_p13 = por %p141_p9, %p83_p1  ;;  %p1431_p0 = por %p147_p10, %p89_p7 }
  0x1d   : > { %p154_p2 = scmp.lt.s32.totalorder %s1305_s17, 4  ;;  %s1557_s0 = sld [smem:[#allocation13_spill]] }
  0x1e   : > { %s1310_s30 = smov [#allocation3]   ;;  %s832_s5 = sshll.u32 %s189_s23, 2 }
  0x1f   : > { %p1439_p3 = pnand %p827_p12, %p154_p2  ;;  %s173_s4 = sshll.u32 %s1310_s30, 4  ;;  %s174_s4 = int_to_ptr.vmem [resolvable:$true] %s173_s4 }
  0x20   : > { %s219_s10 = scalar_lea.hbm %s1547_s2, %s831_s24  ;;  %s215_s19 = scalar_lea.vmem [#allocation8], %s832_s5 }
  0x21   : > { %p1045_p1 = pneg %p1439_p3  ;;  %s223_s26 = sshll.u32 %s215_s19, 4  ;;  %s224_s26 = int_to_ptr.vmem [resolvable:$true] %s223_s26 }
  0x22   : > { %s221_s27 = sshll.u32 %s219_s10, 4  ;;  %s1312_s1 = smov 16   ;;  %s222_s27 = int_to_ptr.hbm [resolvable:$true] %s221_s27 }
  0x23   : > { %s171_s28 = sshll.u32 %s1557_s0, 4  ;;  %p1046_p4 = pnand %p1045_p1, %p90_p8  ;;  %s172_s28 = int_to_ptr.hbm [resolvable:$true] %s171_s28 }
  0x24   : > { %s1311_s0 = smov 256   ;;  %232 = sbr.rel (%p1439_p3) target bundleno = 253 (0xfd), region = 32 }
  0x25   : > { %1048 = dma.hbm_to_vmem [thread:$0]  (!%p1046_p4), %s172_s28, 512, %s174_s4, [#allocation4], %s1311_s0, %s1311_s0, %s1312_s1  }
  0x26   : > { %1055 = dma.hbm_to_vmem [thread:$0]  (!%p1400_p6), %s222_s27, 64, %s224_s26, %s1404_s7  }
  0x29   : > { %1272 = dma.done.wait (%p90_p8), [#allocation4], 512  }
  0x2a   : > { %1274 = vsyncadd (%p90_p8), [#allocation4], 4294966784  ;;  %s239_s23 = sand.u32 1, %s1410_s11   ;;  %s1465_s24 = sand.u32 1, %s1289_s13  }
  0x2b   : > { %s836_s0 = sshll.u32 %s1465_s24, 8  ;;  %s240_s1 = scalar_lea.sflag [#allocation7], %s239_s23 }
  0x2c   : > { %s1468_s6 = scalar_lea.vmem [#allocation6], %s836_s0 }
  0x2d   : > { %1276 = dma.done.wait (%p1419_p11), %s240_s1, 4160  }
  0x2e   : > { %1278 = vsyncadd (%p1419_p11), %s240_s1, 4294963136  ;;  %v1026_v0 = vld [vmem:[%s1468_s6 + $0xb8] sm:$0xff]  ;;  %v1025_v2 = vld [vmem:[%s1468_s6 + $0xb0] sm:$0xff]  ;;  %s837_s7 = sshll.u32 %s1465_s24, 2  ;;  %s838_s20 = sshll.u32 %s1465_s24, 4 }
  0x2f   : > { %v1034_v1 = vld [vmem:[%s1468_s6 + $0xf8] sm:$0xff]  ;;  %603 = vmatpush.bf16.msra.mxu2 %v1026_v0  ;;  %v1033_v3 = vld [vmem:[%s1468_s6 + $0xf0] sm:$0xff]  ;;  %v1024_v8 = vld [vmem:[%s1468_s6 + $0xa8] sm:$0xff]  ;;  %s253_s11 = scalar_lea.vmem [#allocation8], %s837_s7  ;;  %s1000_s28 = sshll.u32 %s1297_s15, 3 }
  0x30   : > { %617 = vmatpush.bf16.msra.mxu3 %v1034_v1  ;;  %v1010_v4 = vld [vmem:[%s1468_s6 + $0x38] sm:$0xff]  ;;  %v1009_v6 = vld [vmem:[%s1468_s6 + $0x30] sm:$0xff]  ;;  %v1032_v9 = vld [vmem:[%s1468_s6 + $0xe8] sm:$0xff]  ;;  %s696_s4 = scalar_lea.hbm %s1548_s3, %s1000_s28  ;;  %s281_s5 = scalar_lea.vmem [#allocation9], %s838_s20 }
  0x31   : > { %v1018_v5 = vld [vmem:[%s1468_s6 + $0x78] sm:$0xff]  ;;  %438 = vmatpush.bf16.msra.mxu0 %v1010_v4  ;;  %v1017_v7 = vld [vmem:[%s1468_s6 + $0x70] sm:$0xff]  ;;  %v1008_v10 = vld [vmem:[%s1468_s6 + $0x28] sm:$0xff]  ;;  %s697_s8 = sshll.u32 %s281_s5, 4  ;;  %s699_s9 = sshll.u32 %s696_s4, 4  ;;  %s698_s8 = int_to_ptr.vmem [resolvable:$true] %s697_s8  ;;  %s700_s9 = int_to_ptr.hbm [resolvable:$true] %s699_s9 }
  0x32   : > { %452 = vmatpush.bf16.msra.mxu1 %v1018_v5  ;;  %v1016_v11 = vld [vmem:[%s1468_s6 + $0x68] sm:$0xff]  ;;  %v1023_v12 = vld [vmem:[%s1468_s6 + $0xa0] sm:$0xff]  ;;  %v1022_v16 = vld [vmem:[%s1468_s6 + $0x98] sm:$0xff]  ;;  %s683_s15 = scalar_lea.sflag [#allocation5], %s1465_s24  ;;  %s1233_s10 = sshra.s32 %s700_s9, 4  ;;  %s1234_s10 = int_to_ptr.hbm [resolvable:$true] %s1233_s10 }
  0x33   : > { %604 = vmatpush.bf16.msra.mxu2 %v1025_v2  ;;  %v1031_v13 = vld [vmem:[%s1468_s6 + $0xe0] sm:$0xff]  ;;  %v1030_v17 = vld [vmem:[%s1468_s6 + $0xd8] sm:$0xff]  ;;  %v1021_v20 = vld [vmem:[%s1468_s6 + $0x90] sm:$0xff]  ;;  %s1235_s19 = scalar_lea.hbm %s1234_s10, 16  ;;  %s1239_s23 = scalar_lea.hbm %s1548_s3, 48 }
  0x34   : > { %618 = vmatpush.bf16.msra.mxu3 %v1033_v3  ;;  %v1007_v14 = vld [vmem:[%s1468_s6 + $0x20] sm:$0xff]  ;;  %v1006_v18 = vld [vmem:[%s1468_s6 + $0x18] sm:$0xff]  ;;  %v1029_v21 = vld [vmem:[%s1468_s6 + $0xd0] sm:$0xff]  ;;  %p1236_p5 = scmp.ne.s32.totalorder %s1234_s10, %s1235_s19  ;;  %p1240_p8 = scmp.lt.s32.totalorder %s1234_s10, %s1548_s3 }
  0x35   : > { %439 = vmatpush.bf16.msra.mxu0 %v1009_v6  ;;  %v1015_v15 = vld [vmem:[%s1468_s6 + $0x60] sm:$0xff]  ;;  %v1014_v19 = vld [vmem:[%s1468_s6 + $0x58] sm:$0xff]  ;;  %v296_v23 = vld [vmem:[#allocation3 + $0x10] sm:$0xff]  ;;  %p1241_p9 = scmp.lt.s32.totalorder %s1239_s23, %s1235_s19 }
  0x36   : > { %453 = vmatpush.bf16.msra.mxu1 %v1017_v7  ;;  %v294_v22 = vld [vmem:[#allocation3] sm:$0xff]  ;;  %v295_v24 = vld [vmem:[#allocation3 + $0x8] sm:$0xff]  ;;  %v297_v25 = vld [vmem:[#allocation3 + $0x18] sm:$0xff]  ;;  %v300_v29 = vmul.f32 %v296_v23, %v296_v23  ;;  %p1237_p6 = pnand %p1236_p5, %p1427_p13 }
  0x37   : > { %605 = vmatpush.bf16.msra.mxu2 %v1024_v8  ;;  %v1005_v26 = vld [vmem:[%s1468_s6 + $0x10] sm:$0xff]  ;;  %v298_v28 = vmul.f32 %v294_v22, %v294_v22  ;;  %v299_v30 = vmul.f32 %v295_v24, %v295_v24  ;;  %v301_v31 = vmul.f32 %v297_v25, %v297_v25  ;;  %v1020_v32 = vld [vmem:[%s1468_s6 + $0x88] sm:$0xff]  ;;  %v1019_v40 = vld [vmem:[%s1468_s6 + $0x80] sm:$0xff]  ;;  %v308_v46 = vpack.c.bf16 %v296_v23, %v294_v22  ;;  %p1242_p10 = por %p1241_p9, %p1240_p8 }
  0x38   : > { %619 = vmatpush.bf16.msra.mxu3 %v1032_v9  ;;  %v1013_v27 = vld [vmem:[%s1468_s6 + $0x50] sm:$0xff]  ;;  %v1028_v33 = vld [vmem:[%s1468_s6 + $0xc8] sm:$0xff]  ;;  %v304_v37 = vmax.f32 %v300_v29, 0.0001  ;;  %v1027_v41 = vld [vmem:[%s1468_s6 + $0xc0] sm:$0xff]  ;;  %v309_v47 = vpack.c.bf16 %v297_v25, %v295_v24  ;;  %p1238_p7 = pneg %p1237_p6 }
  0x39   : > { %440 = vmatpush.bf16.msra.mxu0 %v1008_v10  ;;  %v302_v34 = vmax.f32 %v298_v28, 0.0001  ;;  %v1004_v35 = vld [vmem:[%s1468_s6 + $0x8] sm:$0xff]  ;;  %v303_v38 = vmax.f32 %v299_v30, 0.0001  ;;  %v1003_v42 = vld [vmem:[%s1468_s6] sm:$0xff] }
  0x3a   : > { %454 = vmatpush.bf16.msra.mxu1 %v1016_v11  ;;  %v1012_v36 = vld [vmem:[%s1468_s6 + $0x48] sm:$0xff]  ;;  %v305_v39 = vmax.f32 %v301_v31, 0.0001  ;;  %v1011_v43 = vld [vmem:[%s1468_s6 + $0x40] sm:$0xff]  ;;  %p1243_p11 = pnand %p1242_p10, %p1238_p7 }
  0x3b   : > { %606 = vmatpush.bf16.msra.mxu2 %v1023_v12  ;;  %v472_v44 = vpack.c.bf16 %v304_v37, %v302_v34  ;;  %v1123_v48 = vld [vmem:[%s253_s11 + $0x1] ss:$0 sm:$0xff]  ;;  %v1122_v2 = vld [vmem:[%s253_s11] ss:$0 sm:$0xff]  ;;  %v1124_v6 = vld [vmem:[%s253_s11 + $0x2] ss:$0 sm:$0xff] }
  0x3c   : > { %620 = vmatpush.bf16.msra.mxu3 %v1031_v13  ;;  %v473_v45 = vpack.c.bf16 %v305_v39, %v303_v38 }
  0x3d   : > { %441 = vmatpush.bf16.msra.mxu0 %v1007_v14 }
  0x3e   : > { %455 = vmatpush.bf16.msra.mxu1 %v1015_v15 }
  0x3f   : > { %607 = vmatpush.bf16.msra.mxu2 %v1022_v16 }
  0x40   : > { %621 = vmatpush.bf16.msra.mxu3 %v1030_v17 }
  0x41   : > { %442 = vmatpush.bf16.msra.mxu0 %v1006_v18 }
  0x42   : > { %456 = vmatpush.bf16.msra.mxu1 %v1014_v19 }
  0x43   : > { %608 = vmatpush.bf16.msra.mxu2 %v1021_v20 }
  0x44   : > { %622 = vmatpush.bf16.msra.mxu3 %v1029_v21 }
  0x45   : > { %443 = vmatpush.bf16.msra.mxu0 %v1005_v26 }
  0x46   : > { %457 = vmatpush.bf16.msra.mxu1 %v1013_v27 }
  0x47   : > { %609 = vmatpush.bf16.msra.mxu2 %v1020_v32 }
  0x48   : > { %623 = vmatpush.bf16.msra.mxu3 %v1028_v33 }
  0x49   : > { %444 = vmatpush.bf16.msra.mxu0 %v1004_v35 }
  0x4a   : > { %458 = vmatpush.bf16.msra.mxu1 %v1012_v36 }
  0x4b   : > { %610 = vmatpush.bf16.msra.mxu2 %v1019_v40 }
  0x4c   : > { %624 = vmatpush.bf16.msra.mxu3 %v1027_v41 }
  0x4d   : > { %445 = vmatpush.bf16.msra.mxu0 %v1003_v42 }
  0x4e   : > { %459 = vmatpush.bf16.msra.mxu1 %v1011_v43  ;;  %611 = vmatmul.bf16.vlgmr.msra.gmra.mxu2 %v472_v44 }
  0x4f   : > { %625 = vmatmul.bf16.vlgmr.msra.gmra.mxu3 %v473_v45 }
  0x50   : > { %446 = vmatmul.bf16.vlgmr.msra.gmra.mxu0 %v308_v46 }
  0x51   : > { %460 = vmatmul.bf16.vlgmr.msra.gmra.mxu1 %v309_v47 }
  0xcd   : > { %v447_v59 = vpop.f32.mrf.mxu0 }
  0xce   : > { %v461_v60 = vpop.f32.mrf.mxu1 }
  0xcf   : > { %v462_v63 = vadd.f32 %v461_v60, %v447_v59 }
  0xd1   : > { %v612_v49 = vpop.f32.mrf.mxu2  ;;  %v644_v12 = vadd.f32 %v1122_v2, %v462_v63 }
  0xd2   : > { %v626_v50 = vpop.f32.mrf.mxu3 }
  0xd3   : > { %v627_v51 = vadd.f32 %v626_v50, %v612_v49 }
  0xd5   : > { %v649_v52 = vadd.f32 %v1123_v48, %v627_v51  ;;  %v449_v9 = vpop.f32.mrf.mxu0 }
  0xd6   : > { %v463_v10 = vpop.f32.mrf.mxu1 }
  0xd7   : > { %1125 = vrsqrt.f32 %v649_v52  ;;  %vm658_vm0 = vcmp.eq.f32.partialorder %v649_v52, inf  ;;  %v661_v8 = vand.u32 2147483648, %v649_v52  ;;  %vm660_vm1 = vcmp.eq.f32.partialorder %v649_v52, 0.0 }
  0xd8   : > { %v464_v17 = vadd.f32 %v463_v10, %v449_v9 }
  0xd9   : > { %v614_v53 = vpop.f32.mrf.mxu2 }
  0xda   : > { %v628_v54 = vpop.f32.mrf.mxu3  ;;  %v645_v24 = vadd.f32 %v1122_v2, %v464_v17 }
  0xdb   : > { %v629_v55 = vadd.f32 %v628_v54, %v614_v53 }
  0xdd   : > { %v1126_v56 = vpop.eup %1125  ;;  %v650_v57 = vadd.f32 %v1123_v48, %v629_v55 }
  0xde   : > { %v652_v58 = vmul.f32 %v1126_v56, %v649_v52 }
  0xdf   : > { %1127 = vrsqrt.f32 %v650_v57  ;;  %vm670_vm2 = vcmp.eq.f32.partialorder %v650_v57, inf  ;;  %v673_v21 = vand.u32 2147483648, %v650_v57  ;;  %vm672_vm3 = vcmp.eq.f32.partialorder %v650_v57, 0.0 }
  0xe0   : > { %v653_v61 = vmul.f32 %v1126_v56, %v652_v58 }
  0xe2   : > { %v654_v62 = vmul.f32 0.5, %v653_v61 }
  0xe4   : > { %v655_v0 = vsub.f32 1.5, %v654_v62 }
  0xe5   : > { %v1128_v1 = vpop.eup %1127 }
  0xe6   : > { %v656_v3 = vmul.f32 %v1126_v56, %v655_v0  ;;  %v664_v4 = vmul.f32 %v1128_v1, %v650_v57 }
  0xe8   : > { %v657_v5 = vmul.f32 %v656_v3, %v649_v52  ;;  %v665_v7 = vmul.f32 %v1128_v1, %v664_v4 }
  0xea   : > { %v659_v11 = vsel %vm658_vm0, %v649_v52, %v657_v5  ;;  %v666_v13 = vmul.f32 0.5, %v665_v7 }
  0xeb   : > { %v662_v14 = vsel %vm660_vm1, %v661_v8, %v659_v11 }
  0xec   : > { %v676_v15 = vmul.f32 %v1124_v6, %v662_v14  ;;  %v667_v16 = vsub.f32 1.5, %v666_v13 }
  0xee   : > { %v678_v18 = vadd.f32 %v676_v15, %v644_v12  ;;  %v668_v19 = vmul.f32 %v1128_v1, %v667_v16 }
  0xf0   : > { %680 = vst [vmem:[%s281_s5] sm:$0xff] %v678_v18  ;;  %v669_v20 = vmul.f32 %v668_v19, %v650_v57 }
  0xf2   : > { %v671_v22 = vsel %vm670_vm2, %v650_v57, %v669_v20 }
  0xf3   : > { %v674_v23 = vsel %vm672_vm3, %v673_v21, %v671_v22 }
  0xf4   : > { %v677_v25 = vmul.f32 %v1124_v6, %v674_v23 }
  0xf6   : > { %v679_v26 = vadd.f32 %v677_v25, %v645_v24 }
  0xf8   : > { %681 = vst [vmem:[%s281_s5 + $0x8] sm:$0xff] %v679_v26 }
  0xf9   : > { %1246 = shalt.err (!%p1243_p11)
}
  0xfa   : > { %s1313_s24 = smov 128   ;;  %s1314_s6 = smov 384  }
  0xfb   : > { %s1315_s7 = smov 8  }
  0xfc   : > { %1043 = dma.vmem_to_hbm [thread:$0]  (%p1427_p13), %s698_s8, 256, %s700_s9, %s683_s15, %s1313_s24, %s1314_s6, %s1315_s7  }
  0xfd PF: > { %p1063_p12 = scmp.ge.s32.totalorder %s1305_s17, 2  ;;  %s714_s11 = sand.u32 1, %s1285_s12  }
  0xfe   : > { %s715_s20 = scalar_lea.sflag [#allocation5], %s714_s11 }
  0xff   : > { %p1057_p2 = pnand %p1063_p12, %p1431_p0 }
 0x101   : > { %p1058_p3 = pneg %p1057_p2 }
 0x103   : > { %1280 = dma.done.wait (%p1058_p3), %s715_s20, 256  }
 0x104   : > { %1282 = vsyncadd (%p1058_p3), %s715_s20, 4294967040  ;;  %s20_s17 = sadd.s32 1, %s1305_s17   ;;  %s1559_s12 = smov %s1289_s13 }
 0x105   : > { %p17_p1 = scmp.ge.s32.totalorder %s20_s17, 5   ;;  %s1560_s13 = smov %s1293_s14 }
 0x106   : > { %s1561_s14 = smov %s1387_s25  ;;  %s1562_s15 = smov %s1301_s16 }
 0x107   : > { %s1563_s16 = smov %s1565_s18  ;;  %19 = sbr.rel (!%p17_p1) target bundleno = 10 (0xa), region = 103 }
 0x10c   :  { %721 = vsyncpa [#allocation4], 1 }
 0x10d   :  { %723 = vsyncpa [#allocation4 + $0x1], 1 }
 0x10e   :  { %724 = vsyncpa [#allocation7], 1 }
 0x10f   :  { %726 = vsyncpa [#allocation7 + $0x1], 1 }
 0x110   :  { %727 = vsyncpa [#allocation5], 1 }
 0x111   :  { %729 = vsyncpa [#allocation5 + $0x1], 1 }

</bundles_post_ra>
